<compile_context>
chip_gen: v6e
topology: v6e:2x2x1
jax: 0.10.0
libtpu: 0.0.40
codegen_flags: <defaults>
</compile_context>

<pallas_src>
import jax
import jax.numpy as jnp
from jax.experimental import pallas as pl
from jax.experimental.pallas import tpu as pltpu


def _round_up(x, m):
    return ((x + m - 1) // m) * m


def _cdiv(a, b):
    return (a + b - 1) // b


# ----------------------------- kernels -------------------------------------


def _matmul_kernel_single_k(a_ref, b_ref, o_ref):
    # Whole K lives in one block: single MXU-resident reduction, no acc round-trips.
    o_ref[...] = jnp.dot(
        a_ref[...], b_ref[...], preferred_element_type=jnp.float32
    ).astype(o_ref.dtype)


def _matmul_kernel_split_k(a_ref, b_ref, o_ref, acc_ref):
    # Reduction (K) is the last ("arbitrary") grid axis; accumulate in f32 scratch.
    @pl.when(pl.program_id(2) == 0)
    def _():
        acc_ref[...] = jnp.zeros_like(acc_ref)

    acc_ref[...] += jnp.dot(a_ref[...], b_ref[...], preferred_element_type=jnp.float32)

    @pl.when(pl.program_id(2) == pl.num_programs(2) - 1)
    def _():
        o_ref[...] = acc_ref[...].astype(o_ref.dtype)


# --------------------------- tile selection ---------------------------------


def _vmem_capacity_bytes():
    try:
        return int(pltpu.get_tpu_info().vmem_capacity_bytes)
    except Exception:
        return 64 * 1024 * 1024  # conservative (v7x-sized) fallback


def _footprint_single_k(tm, tn, k, isz, osz, a_bufs):
    # A held a_bufs-deep; B and output double-buffered by the pipeline.
    return a_bufs * tm * k * isz + 2 * k * tn * isz + 2 * tm * tn * osz


def _footprint_split_k(tm, tn, tk, isz, osz):
    # A, B, output double-buffered; f32 accumulator scratch.
    return 2 * (tm * tk + tk * tn) * isz + 2 * tm * tn * osz + tm * tn * 4


# ------------------------------ wrapper -------------------------------------


def my_matmul(a, b, *, tm=1024, tn=1024, tk=1024, compute_dtype="auto"):
    """2-D matmul with torch.matmul semantics: [M,K] @ [K,N] -> [M,N]."""
    M, K = a.shape
    Kb, N = b.shape
    assert K == Kb, "inner dims must match"

    out_dtype = jnp.result_type(a.dtype, b.dtype)
    if compute_dtype == "auto":
        # Feed the MXU bf16 when inputs are f32 (2-3x MXU throughput, half the HBM
        # bytes); accumulation stays f32, output stays f32. Numerics differ from
        # strict f32 torch.matmul by bf16 operand rounding only.
        compute_dtype = jnp.bfloat16 if out_dtype == jnp.float32 else None
    if compute_dtype is not None:
        a = a.astype(compute_dtype)
        b = b.astype(compute_dtype)

    isz = jnp.dtype(a.dtype).itemsize
    osz = jnp.dtype(out_dtype).itemsize
    sublane = max(8, 32 // isz)  # 8 for f32, 16 for bf16

    vmem_cap = _vmem_capacity_bytes()
    budget = int(vmem_cap * 0.70)      # ~90 MiB on v5e/v6e, ~45 MiB on v7x
    limit_cap = int(vmem_cap * 0.85)

    K128 = _round_up(K, 128)

    # Clamp tiles to the problem size (rounded up to hardware tiling granules).
    tm_eff = min(_round_up(tm, sublane), _round_up(M, sublane))
    tn_eff = min(_round_up(tn, 128), _round_up(N, 128))

    # A is resident across the inner j loop; if there are >= 2 j tiles it only needs
    # one buffer (shrinking tn below never decreases the j-tile count).
    a_bufs = 1 if _cdiv(N, tn_eff) >= 2 else 2

    # --- Prefer collapsing K entirely when full-K blocks fit the VMEM budget. ---
    # Shrink tn first (B traffic in this path is set by tm only), then tm.
    tm_sk, tn_sk = tm_eff, tn_eff
    while _footprint_single_k(tm_sk, tn_sk, K128, isz, osz, a_bufs) > budget and tn_sk > 256:
        tn_sk = max(256, _round_up(tn_sk // 2, 128))
    while _footprint_single_k(tm_sk, tn_sk, K128, isz, osz, a_bufs) > budget and tm_sk > 256:
        tm_sk = max(256, _round_up(tm_sk // 2, sublane))
    split_k = _footprint_single_k(tm_sk, tn_sk, K128, isz, osz, a_bufs) > budget

    if split_k:
        tk_eff = min(_round_up(tk, 128), K128)
        while _footprint_split_k(tm_eff, tn_eff, tk_eff, isz, osz) > budget:
            if tk_eff > 256:
                tk_eff = max(256, _round_up(tk_eff // 2, 128))
            elif tn_eff > 128:
                tn_eff = max(128, _round_up(tn_eff // 2, 128))
            elif tm_eff > sublane:
                tm_eff = max(sublane, _round_up(tm_eff // 2, sublane))
            else:
                break
    else:
        tm_eff, tn_eff = tm_sk, tn_sk
        tk_eff = K128

    # Guarantee >= 2 output tiles so dual-TensorCore chips (v7x) can shard the
    # "parallel" axes; negligible overhead on single-core generations.
    if _cdiv(M, tm_eff) * _cdiv(N, tn_eff) == 1:
        if N > 128:
            tn_eff = max(128, _round_up(_cdiv(tn_eff, 2), 128))
        elif M > sublane:
            tm_eff = max(sublane, _round_up(_cdiv(tm_eff, 2), sublane))

    # Only the K tail is correctness-critical: zero-pad K to the K-block size.
    # M/N edges are handled by Pallas partial blocks (no full-array pad, no slice).
    Kp = _round_up(K, tk_eff) if split_k else K128
    if Kp != K:
        a = jnp.pad(a, ((0, 0), (0, Kp - K)))
        b = jnp.pad(b, ((0, Kp - K), (0, 0)))

    grid_m = _cdiv(M, tm_eff)
    grid_n = _cdiv(N, tn_eff)

    if not split_k:
        grid = (grid_m, grid_n)
        a_spec_kwargs = {}
        if grid_n >= 2:
            # A's block index (i, 0) only changes once per i-row: single-buffer it.
            a_spec_kwargs = dict(pipeline_mode=pl.Buffered(1))
        in_specs = [
            pl.BlockSpec((tm_eff, Kp), lambda i, j: (i, 0), **a_spec_kwargs),
            pl.BlockSpec((Kp, tn_eff), lambda i, j: (0, j)),
        ]
        out_spec = pl.BlockSpec((tm_eff, tn_eff), lambda i, j: (i, j))
        scratch = ()
        kernel = _matmul_kernel_single_k
        dims = ("parallel", "parallel")
        footprint = _footprint_single_k(tm_eff, tn_eff, Kp, isz, osz,
                                        1 if grid_n >= 2 else 2)
        bytes_accessed = M * Kp * isz + grid_m * Kp * N * isz + M * N * osz
    else:
        grid = (grid_m, grid_n, Kp // tk_eff)
        in_specs = [
            pl.BlockSpec((tm_eff, tk_eff), lambda i, j, k: (i, k)),
            pl.BlockSpec((tk_eff, tn_eff), lambda i, j, k: (k, j)),
        ]
        out_spec = pl.BlockSpec((tm_eff, tn_eff), lambda i, j, k: (i, j))
        scratch = (pltpu.VMEM((tm_eff, tn_eff), jnp.float32),)
        kernel = _matmul_kernel_split_k
        dims = ("parallel", "parallel", "arbitrary")
        footprint = _footprint_split_k(tm_eff, tn_eff, tk_eff, isz, osz)
        bytes_accessed = grid_n * M * Kp * isz + grid_m * Kp * N * isz + M * N * osz

    vmem_limit = min(max(footprint + (16 << 20), 32 << 20), limit_cap)
    vmem_limit = max(vmem_limit, footprint + (4 << 20))  # never below the footprint

    cost = pl.CostEstimate(
        flops=2 * M * N * K,
        transcendentals=0,
        bytes_accessed=int(bytes_accessed),
    )

    out = pl.pallas_call(
        kernel,
        out_shape=jax.ShapeDtypeStruct((M, N), out_dtype),
        grid_spec=pltpu.PrefetchScalarGridSpec(
            num_scalar_prefetch=0,
            grid=grid,
            in_specs=in_specs,
            out_specs=out_spec,
            scratch_shapes=scratch,
        ),
        compiler_params=pltpu.CompilerParams(
            dimension_semantics=dims,
            vmem_limit_bytes=int(vmem_limit),
        ),
        cost_estimate=cost,
    )(a, b)
    return out


if __name__ == "__main__":
    key = jax.random.PRNGKey(0)
    ka, kb, kc, kd = jax.random.split(key, 4)

    # Case 1: tile-aligned shapes, default auto-bf16 MXU feed (f32 accumulation).
    M, K, N = 256, 512, 256
    a = jax.random.normal(ka, (M, K), dtype=jnp.float32)
    b = jax.random.normal(kb, (K, N), dtype=jnp.float32)
    out = jax.block_until_ready(my_matmul(a, b))
    ref = a @ b
    assert out.shape == (M, N) and out.dtype == jnp.float32
    # bf16 operand rounding => relaxed tolerance (accumulation is still f32).
    assert jnp.allclose(out, ref, atol=1.0, rtol=5e-2), "mismatch (bf16-feed path)"

    # Case 2: strict f32 path, non-tile-aligned shapes (partial M/N blocks, K pad).
    M2, K2, N2 = 72, 200, 96
    a2 = jax.random.normal(kc, (M2, K2), dtype=jnp.float32)
    b2 = jax.random.normal(kd, (K2, N2), dtype=jnp.float32)
    out2 = jax.block_until_ready(my_matmul(a2, b2, compute_dtype=jnp.float32))
    ref2 = a2 @ b2
    assert out2.shape == (M2, N2)
    assert jnp.allclose(out2, ref2, atol=1e-3, rtol=1e-3), "mismatch (f32 padded-K path)"

    # Case 3: default bf16 feed on non-aligned shapes (>=2-tile split + partial blocks).
    out3 = jax.block_until_ready(my_matmul(a2, b2))
    assert out3.shape == (M2, N2)
    assert jnp.allclose(out3, ref2, atol=0.5, rtol=5e-2), "mismatch (bf16 non-aligned path)"

    print("KERNEL_OK")
</pallas_src>

<mosaic_0001>
module attributes {stable_mosaic.version = 11 : i64} {
  func.func @_matmul_kernel_single_k(%arg0: i32, %arg1: i32, %arg2: memref<256x512xbf16, #tpu.memory_space<vmem>>, %arg3: memref<512x128xbf16, #tpu.memory_space<vmem>>, %arg4: memref<256x128xf32, #tpu.memory_space<vmem>>) attributes {dimension_semantics = [#tpu.dimension_semantics<parallel>, #tpu.dimension_semantics<parallel>], iteration_bounds = array<i64: 1, 2>, scalar_prefetch = 0 : i64, scratch_operands = 0 : i64, tpu.core_type = #tpu.core_type<tc>, window_params = [{pipeline_mode = #tpu.pipeline_mode<synchronous>, transform_indices = @transform_0, window_bounds = array<i64: 256, 512>}, {transform_indices = @transform_1, window_bounds = array<i64: 512, 128>}, {transform_indices = @transform_2, window_bounds = array<i64: 256, 128>}]} {
    %c0 = arith.constant 0 : index
    %c0_0 = arith.constant 0 : index
    %0 = vector.load %arg2[%c0, %c0_0] : memref<256x512xbf16, #tpu.memory_space<vmem>>, vector<256x512xbf16>
    %c0_1 = arith.constant 0 : index
    %c0_2 = arith.constant 0 : index
    %1 = vector.load %arg3[%c0_1, %c0_2] : memref<512x128xbf16, #tpu.memory_space<vmem>>, vector<512x128xbf16>
    %cst = arith.constant dense<0.000000e+00> : vector<256x128xf32>
    %2 = tpu.matmul %0, %1, %cst {dimension_numbers = #tpu.dot_dimension_numbers<[1], [0], [0], [1], [0, 0, 1, 1], [], []>} : vector<256x512xbf16>, vector<512x128xbf16>, vector<256x128xf32> -> vector<256x128xf32>
    %c0_3 = arith.constant 0 : index
    %c0_4 = arith.constant 0 : index
    %3 = vector.load %arg4[%c0_3, %c0_4] : memref<256x128xf32, #tpu.memory_space<vmem>>, vector<256x128xf32>
    tpu.vector_store %arg4[%c0_3, %c0_4], %2 {strides = array<i32>} : memref<256x128xf32, #tpu.memory_space<vmem>>, vector<256x128xf32>,
    return
  }
  func.func @transform_0(%arg0: i32, %arg1: i32) -> (i32, i32) {
    %c0_i32 = arith.constant 0 : i32
    %c0_i32_0 = arith.constant 0 : i32
    return %arg0, %c0_i32 : i32, i32
  }
  func.func @transform_1(%arg0: i32, %arg1: i32) -> (i32, i32) {
    %c0_i32 = arith.constant 0 : i32
    %c0_i32_0 = arith.constant 0 : i32
    return %c0_i32, %arg1 : i32, i32
  }
  func.func @transform_2(%arg0: i32, %arg1: i32) -> (i32, i32) {
    %c0_i32 = arith.constant 0 : i32
    return %arg0, %arg1 : i32, i32
  }
}

</mosaic_0001>

<bundles_post_ra>
// kernel: tpu_custom_call.1
= control target key start
LH: loop header
LB: loop body
LE: loop exit
PB: predicated region body
PF: predicated region fallthrough
CT: control target
= control target key end

     0   :  { %7 = vsyncpa [#allocation3], 0  ;;  %s2267_s0 = inlined_call_operand.hbm [shape: bf16[256,512], index: 0, kind: input, shape index: {}]   ;;  %s2268_s1 = inlined_call_operand.hbm [shape: bf16[512,256], index: 1, kind: input, shape index: {}]   ;;  %s2269_s2 = inlined_call_operand.hbm [shape: f32[256,256], index: 2, kind: output, shape index: {}]  }
   0x1   :  { %8 = vsyncpa [#allocation6], 0 }
   0x2   :  { %10 = vsyncpa [#allocation6 + $0x1], 0 }
   0x3   :  { %11 = vsyncpa [#allocation4], 0 }
   0x4   :  { %13 = vsyncpa [#allocation4 + $0x1], 0  ;;  %s2019_s9 = smov 0   ;;  %s2021_s10 = smov 0  }
   0x5   :  { %s2023_s11 = smov 0   ;;  %s2025_s12 = smov 0  }
   0x6   :  { %s2027_s13 = smov 0   ;;  %s2029_s14 = smov 0  }
   0x7 LB: > { %2274 = sst [smem:[#allocation11_spill]] %s1991_s14  ;;  %s1309_s15 = sadd.s32 4294967295, %s1991_s14   ;;  %s1991_s14 = sphi %s2029_s14, %s2293_s14   ;;  %s1987_s13 = sphi %s2027_s13, %s2292_s13   ;;  %s1983_s12 = sphi %s2025_s12, %s2291_s12   ;;  %s1979_s11 = sphi %s2023_s11, %s2290_s11   ;;  %s1975_s10 = sphi %s2021_s10, %s2289_s10   ;;  %s1971_s9 = sphi %s2019_s9, %s2288_s9  }
   0x8   : > { %s1310_s16 = sadd.s32 4294967294, %s1991_s14   ;;  %p71_p0 = scmp.ne.s32.totalorder %s1979_s11, %s1975_s10 }
   0x9   : > { %p72_p1 = scmp.eq.s32.totalorder %s1991_s14, 0  ;;  %p77_p2 = scmp.ne.s32.totalorder %s1975_s10, %s1971_s9 }
   0xa   : > { %p2056_p3 = scmp.eq.s32.totalorder %s1309_s15, 0  ;;  %p103_p5 = scmp.eq.s32.totalorder %s1309_s15, 1 }
   0xb   : > { %p2060_p4 = por %p72_p1, %p71_p0  ;;  %p109_p7 = scmp.eq.s32.totalorder %s1310_s16, 1 }
   0xc   : > { %p2066_p6 = por %p2056_p3, %p77_p2  ;;  %p2070_p8 = por %p103_p5, %p71_p0 }
   0xd   : > { %p1311_p9 = scmp.ge.s32.totalorder %s1991_s14, 1  ;;  %p2075_p10 = por %p109_p7, %p77_p2 }
   0xe   : > { %s2277_s19 = scalar_select %p2066_p6, 1, 0 }
   0xf   : > { %s2278_s20 = scalar_select %p2070_p8, 1, 0 }
  0x10   : > { %s2279_s21 = scalar_select %p2075_p10, 1, 0 }
  0x11   : > { %p116_p11 = scmp.lt.s32.totalorder %s1991_s14, 3  ;;  %s1993_s23 = smov [#allocation2]  }
  0x12   : > { %s132_s24 = sshll.u32 %s1993_s23, 4  ;;  %p1665_p1 = scmp.lt.s32.totalorder %s1991_s14, 2  ;;  %s133_s24 = int_to_ptr.vmem [resolvable:$true] %s132_s24 }
  0x13   : > { %p2080_p12 = pnand %p1311_p9, %p116_p11  ;;  %s28_s27 = sadd.s32 1, %s1987_s13 }
  0x14   : > { %p2096_p2 = pnand %p1665_p1, %p2060_p4  ;;  %s1864_s28 = scalar_lea.vmem %s133_s24, 8192 }
  0x15   : > { %p1652_p13 = pneg %p2080_p12  ;;  %p1865_p9 = scmp.ne.s32.totalorder %s133_s24, %s1864_s28 }
  0x16   : > { %p1872_p0 = scmp.lt.s32.totalorder %s133_s24, %s133_s24  ;;  %p1873_p8 = scmp.lt.s32.totalorder %s1864_s28, %s1864_s28 }
  0x17   : > { %p2090_p5 = pnand %p1652_p13, %p2056_p3 }
  0x18   : > { %p1874_p6 = por %p1873_p8, %p1872_p0 }
  0x19   : > { %p1855_p7 = pneg %p2090_p5 }
  0x1b   : > { %p1867_p11 = pnand %p1865_p9, %p1855_p7 }
  0x1d   : > { %p1868_p10 = pneg %p1867_p11 }
  0x1f   : > { %p1875_p13 = pnand %p1874_p6, %p1868_p10 }
  0x21   : > { %1878 = shalt.err (!%p1875_p13)
}
  0x22   : > { %s1994_s29 = smov 256   ;;  %s1995_s30 = smov 16  }
  0x23   : > { %1655 = dma.hbm_to_vmem [thread:$0]  (!%p2090_p5), %s2267_s0, 8192, %s133_s24, [#allocation3], %s1994_s29, %s1994_s29, %s1995_s30  }
  0x24   : > { %p29_p4 = scmp.ge.s32.totalorder %s28_s27, 2  ;;  %s64_s5 = sadd.s32 1, %s1979_s11 }
  0x25   : > { %s146_s6 = sand.u32 1, %s1979_s11   ;;  %s1315_s15 = sshll.u32 %s1987_s13, 6 }
  0x26   : > { %s2295_s27 = smov (%p29_p4, %s28_s27), 0  ;;  %s1314_s7 = sshll.u32 %s146_s6, 8 }
  0x27   : > { %s61_s8 = ssub.s32 %s1987_s13, %s2295_s27  ;;  %s155_s23 = scalar_lea.hbm %s2268_s1, %s1315_s15 }
  0x28   : > { %p62_p6 = scmp.eq.s32.totalorder %s61_s8, 0  ;;  %s150_s25 = scalar_lea.vmem [#allocation5], %s1314_s7 }
  0x29   : > { %s156_s28 = sshll.u32 %s150_s25, 4  ;;  %s147_s24 = scalar_lea.sflag [#allocation6], %s146_s6  ;;  %s157_s28 = int_to_ptr.vmem [resolvable:$true] %s156_s28 }
  0x2a   : > { %s2119_s14 = scalar_select %p62_p6, %s1979_s11, %s64_s5  }
  0x2b   : > { %p1881_p8 = pneg %p2096_p2  ;;  %s1892_s29 = scalar_lea.vmem %s157_s28, 4096 }
  0x2c   : > { %p1893_p10 = scmp.ne.s32.totalorder %s157_s28, %s1892_s29  ;;  %s1996_s30 = smov [#allocation5]  }
  0x2d   : > { %s1897_s3 = sshll.u32 %s1996_s30, 4  ;;  %s1898_s3 = int_to_ptr.vmem [resolvable:$false] %s1897_s3 }
  0x2e   : > { %p1895_p0 = pnand %p1893_p10, %p1881_p8  ;;  %s1899_s4 = scalar_lea.vmem %s1898_s3, 8192 }
  0x2f   : > { %p1900_p5 = scmp.lt.s32.totalorder %s157_s28, %s1898_s3  ;;  %p1901_p7 = scmp.lt.s32.totalorder %s1899_s4, %s1892_s29 }
  0x30   : > { %p1896_p1 = pneg %p1895_p0 }
  0x31   : > { %p1902_p9 = por %p1901_p7, %p1900_p5 }
  0x33   : > { %p1903_p11 = pnand %p1902_p9, %p1896_p1 }
  0x35   : > { %1906 = shalt.err (!%p1903_p11)
}
  0x36   : > { %s1997_s7 = smov 128   ;;  %s1998_s5 = smov 64  }
  0x37   : > { %s1999_s8 = smov 4   ;;  %168 = sbr.rel (%p2080_p12) target bundleno = 438 (0x1b6), region = 28 }
  0x38   : > { %1659 = dma.hbm_to_vmem [thread:$0]  (!%p2096_p2), %s155_s23, 4096, %s157_s28, %s147_s24, %s1997_s7, %s1998_s5, %s1999_s8  }
  0x3c   : > { %1958 = dma.done.wait (%p2056_p3), [#allocation3], 8192  }
  0x3d   : > { %1960 = vsyncadd (%p2056_p3), [#allocation3], 4294959104  ;;  %s2132_s6 = sand.u32 1, %s1975_s10   ;;  %p2283_p2 = scmp.ne.s32.totalorder %s2277_s19, 0 }
  0x3e   : > { %s1318_s15 = sshll.u32 %s2132_s6, 8  ;;  %s175_s16 = scalar_lea.sflag [#allocation6], %s2132_s6 }
  0x3f   : > { %s2138_s26 = scalar_lea.vmem [#allocation5], %s1318_s15 }
  0x40   : > { %1962 = dma.done.wait (%p2283_p2), %s175_s16, 4096  }
  0x41   : > { %1964 = vsyncadd (%p2283_p2), %s175_s16, 4294963200  ;;  %v1725_v0 = vld [vmem:[%s2138_s26 + $0x78] sm:$0xff]   ;;  %v1729_v4 = vld [vmem:[%s2138_s26 + $0x70] sm:$0xff]   ;;  %s2178_s17 = scalar_lea.vmem [#allocation7], %s1318_s15  ;;  %s1417_s19 = sshll.u32 %s1983_s12, 7 }
  0x42   : > { %v1726_v1 = vld [vmem:[%s2138_s26 + $0xf8] sm:$0xff]   ;;  %1420 = vmatprep.subr.bf16.mxu0 %v1725_v0  ;;  %v1730_v5 = vld [vmem:[%s2138_s26 + $0xf0] sm:$0xff]   ;;  %v1733_v8 = vld [vmem:[%s2138_s26 + $0x68] sm:$0xff]   ;;  %s1212_s22 = sshll.u32 %s2178_s17, 4  ;;  %s2216_s25 = scalar_lea.hbm %s2269_s2, %s1417_s19  ;;  %s2218_s22 = int_to_ptr.vmem [resolvable:$true] %s1212_s22 }
  0x43   : > { %v1727_v2 = vld [vmem:[%s2138_s26 + $0x38] sm:$0xff]   ;;  %1532 = vmatprep.subr.bf16.mxu1 %v1726_v1  ;;  %v1731_v6 = vld [vmem:[%s2138_s26 + $0x30] sm:$0xff]   ;;  %v1734_v9 = vld [vmem:[%s2138_s26 + $0xe8] sm:$0xff]   ;;  %s1197_s12 = scalar_lea.sflag [#allocation4], %s2132_s6  ;;  %s1907_s28 = scalar_lea.vmem %s2218_s22, 4096 }
  0x44   : > { %v1728_v3 = vld [vmem:[%s2138_s26 + $0xb8] sm:$0xff]   ;;  %1421 = vmatpush3.bf16.msra.mxu0 %v1727_v2  ;;  %v1732_v7 = vld [vmem:[%s2138_s26 + $0xb0] sm:$0xff]   ;;  %v1735_v10 = vld [vmem:[%s2138_s26 + $0x28] sm:$0xff]   ;;  %p1908_p3 = scmp.ne.s32.totalorder %s2218_s22, %s1907_s28  ;;  %p2284_p12 = scmp.ne.s32.totalorder %s2278_s20, 0 }
  0x45   : > { %1533 = vmatpush3.bf16.msra.mxu1 %v1728_v3  ;;  %1422 = vmatprep.subr.bf16.mxu0 %v1729_v4  ;;  %v1736_v11 = vld [vmem:[%s2138_s26 + $0xa8] sm:$0xff]   ;;  %v1737_v12 = vld [vmem:[%s2138_s26 + $0x60] sm:$0xff]   ;;  %v1741_v16 = vld [vmem:[%s2138_s26 + $0x58] sm:$0xff]   ;;  %s2000_s24 = smov [#allocation7]  }
  0x46   : > { %1534 = vmatprep.subr.bf16.mxu1 %v1730_v5  ;;  %v1738_v13 = vld [vmem:[%s2138_s26 + $0xe0] sm:$0xff]   ;;  %v1742_v17 = vld [vmem:[%s2138_s26 + $0xd8] sm:$0xff]   ;;  %v1745_v20 = vld [vmem:[%s2138_s26 + $0x50] sm:$0xff]   ;;  %p1909_p13 = pnand %p1908_p3, %p2284_p12  ;;  %s1911_s29 = sshll.u32 %s2000_s24, 4  ;;  %s1912_s29 = int_to_ptr.vmem [resolvable:$false] %s1911_s29 }
  0x47   : > { %v1739_v14 = vld [vmem:[%s2138_s26 + $0x20] sm:$0xff]   ;;  %v1743_v18 = vld [vmem:[%s2138_s26 + $0x18] sm:$0xff]   ;;  %v1746_v21 = vld [vmem:[%s2138_s26 + $0xd0] sm:$0xff]   ;;  %s1913_s30 = scalar_lea.vmem %s1912_s29, 8192  ;;  %p1914_p6 = scmp.lt.s32.totalorder %s2218_s22, %s1912_s29 }
  0x48   : > { %1423 = vmatpush3.bf16.msra.mxu0 %v1731_v6  ;;  %v1740_v15 = vld [vmem:[%s2138_s26 + $0xa0] sm:$0xff]   ;;  %v1744_v19 = vld [vmem:[%s2138_s26 + $0x98] sm:$0xff]   ;;  %v1747_v22 = vld [vmem:[%s2138_s26 + $0x10] sm:$0xff]   ;;  %p1910_p4 = pneg %p1909_p13  ;;  %p1915_p8 = scmp.lt.s32.totalorder %s1913_s30, %s1907_s28 }
  0x49   : > { %1535 = vmatpush3.bf16.msra.mxu1 %v1732_v7  ;;  %1424 = vmatprep.subr.bf16.mxu0 %v1733_v8  ;;  %v1748_v23 = vld [vmem:[%s2138_s26 + $0x90] sm:$0xff]   ;;  %v1749_v24 = vld [vmem:[%s2138_s26 + $0x48] sm:$0xff]   ;;  %v1753_v28 = vld [vmem:[%s2138_s26 + $0x40] sm:$0xff]  }
  0x4a   : > { %1536 = vmatprep.subr.bf16.mxu1 %v1734_v9  ;;  %v1750_v25 = vld [vmem:[%s2138_s26 + $0xc8] sm:$0xff]   ;;  %v1754_v29 = vld [vmem:[%s2138_s26 + $0xc0] sm:$0xff]   ;;  %p1916_p10 = por %p1915_p8, %p1914_p6 }
  0x4b   : > { %v1751_v26 = vld [vmem:[%s2138_s26 + $0x8] sm:$0xff]   ;;  %v1755_v30 = vld [vmem:[%s2138_s26] sm:$0xff]  }
  0x4c   : > { %1425 = vmatpush3.bf16.msra.mxu0 %v1735_v10  ;;  %v1752_v27 = vld [vmem:[%s2138_s26 + $0x88] sm:$0xff]   ;;  %v1756_v31 = vld [vmem:[%s2138_s26 + $0x80] sm:$0xff]   ;;  %p1917_p0 = pnand %p1916_p10, %p1910_p4 }
  0x4d   : > { %1537 = vmatpush3.bf16.msra.mxu1 %v1736_v11  ;;  %1426 = vmatprep.subr.bf16.mxu0 %v1737_v12  ;;  %v1757_v32 = vld [vmem:[#allocation2] ss:$16 sps:$4 sm:$0xff]   ;;  %v1759_v33 = vld [vmem:[#allocation2 + $0x4] ss:$16 sps:$4 sm:$0xff]   ;;  %v1760_v34 = vld [vmem:[#allocation2 + $0x8] ss:$16 sps:$4 sm:$0xff]  }
  0x4e   : > { %1538 = vmatprep.subr.bf16.mxu1 %v1738_v13  ;;  %v1762_v35 = vld [vmem:[#allocation2 + $0xc] ss:$16 sps:$4 sm:$0xff]   ;;  %874 = vmatprep.mubr.bf16.mxu0 %v1759_v33  ;;  %v1763_v36 = vld [vmem:[#allocation2 + $0x24] ss:$16 sps:$4 sm:$0xff]   ;;  %v1767_v38 = vld [vmem:[#allocation2 + $0x20] ss:$16 sps:$4 sm:$0xff]  }
  0x4f   : > { %1035 = vmatprep.mubr.bf16.mxu1 %v1762_v35  ;;  %v1765_v37 = vld [vmem:[#allocation2 + $0x2c] ss:$16 sps:$4 sm:$0xff]   ;;  %v1768_v39 = vld [vmem:[#allocation2 + $0x28] ss:$16 sps:$4 sm:$0xff]   ;;  %v1769_v40 = vld [vmem:[#allocation2 + $0x44] ss:$16 sps:$4 sm:$0xff]  }
  0x50   : > { %1427 = vmatpush3.bf16.msra.mxu0 %v1739_v14  ;;  %v1771_v41 = vld [vmem:[#allocation2 + $0x4c] ss:$16 sps:$4 sm:$0xff]   ;;  %v1773_v42 = vld [vmem:[#allocation2 + $0x40] ss:$16 sps:$4 sm:$0xff]   ;;  %v1774_v43 = vld [vmem:[#allocation2 + $0x48] ss:$16 sps:$4 sm:$0xff]  }
  0x51   : > { %1539 = vmatpush3.bf16.msra.mxu1 %v1740_v15  ;;  %1428 = vmatprep.subr.bf16.mxu0 %v1741_v16  ;;  %v1775_v44 = vld [vmem:[#allocation2 + $0x64] ss:$16 sps:$4 sm:$0xff]   ;;  %v1777_v45 = vld [vmem:[#allocation2 + $0x6c] ss:$16 sps:$4 sm:$0xff]   ;;  %v1779_v46 = vld [vmem:[#allocation2 + $0x60] ss:$16 sps:$4 sm:$0xff]  }
  0x52   : > { %1540 = vmatprep.subr.bf16.mxu1 %v1742_v17  ;;  %v1780_v47 = vld [vmem:[#allocation2 + $0x68] ss:$16 sps:$4 sm:$0xff]   ;;  %v1781_v48 = vld [vmem:[#allocation2 + $0x84] ss:$16 sps:$4 sm:$0xff]   ;;  %v1783_v49 = vld [vmem:[#allocation2 + $0x8c] ss:$16 sps:$4 sm:$0xff]  }
  0x53   : > { %v1785_v50 = vld [vmem:[#allocation2 + $0x80] ss:$16 sps:$4 sm:$0xff]   ;;  %v1786_v51 = vld [vmem:[#allocation2 + $0x88] ss:$16 sps:$4 sm:$0xff]   ;;  %v1787_v52 = vld [vmem:[#allocation2 + $0xa4] ss:$16 sps:$4 sm:$0xff]  }
  0x54   : > { %1429 = vmatpush3.bf16.msra.mxu0 %v1743_v18  ;;  %v1789_v53 = vld [vmem:[#allocation2 + $0xac] ss:$16 sps:$4 sm:$0xff]   ;;  %v1791_v54 = vld [vmem:[#allocation2 + $0xa0] ss:$16 sps:$4 sm:$0xff]   ;;  %v1792_v55 = vld [vmem:[#allocation2 + $0xa8] ss:$16 sps:$4 sm:$0xff]  }
  0x55   : > { %1541 = vmatpush3.bf16.msra.mxu1 %v1744_v19  ;;  %1430 = vmatprep.subr.bf16.mxu0 %v1745_v20  ;;  %v1793_v56 = vld [vmem:[#allocation2 + $0xc4] ss:$16 sps:$4 sm:$0xff]   ;;  %v1795_v57 = vld [vmem:[#allocation2 + $0xcc] ss:$16 sps:$4 sm:$0xff]   ;;  %v1797_v58 = vld [vmem:[#allocation2 + $0xc0] ss:$16 sps:$4 sm:$0xff]  }
  0x56   : > { %1542 = vmatprep.subr.bf16.mxu1 %v1746_v21  ;;  %v1798_v59 = vld [vmem:[#allocation2 + $0xc8] ss:$16 sps:$4 sm:$0xff]   ;;  %v1799_v60 = vld [vmem:[#allocation2 + $0xe4] ss:$16 sps:$4 sm:$0xff]   ;;  %v1801_v61 = vld [vmem:[#allocation2 + $0xec] ss:$16 sps:$4 sm:$0xff]  }
  0x57   : > { %v1803_v62 = vld [vmem:[#allocation2 + $0xe0] ss:$16 sps:$4 sm:$0xff]   ;;  %v1804_v63 = vld [vmem:[#allocation2 + $0xe8] ss:$16 sps:$4 sm:$0xff]   ;;  %v1805_v0 = vld [vmem:[#allocation2 + $0x104] ss:$16 sps:$4 sm:$0xff]  }
  0x58   : > { %1431 = vmatpush3.bf16.msra.mxu0 %v1747_v22  ;;  %v1807_v1 = vld [vmem:[#allocation2 + $0x10c] ss:$16 sps:$4 sm:$0xff]   ;;  %v1809_v2 = vld [vmem:[#allocation2 + $0x100] ss:$16 sps:$4 sm:$0xff]   ;;  %v1810_v3 = vld [vmem:[#allocation2 + $0x108] ss:$16 sps:$4 sm:$0xff]  }
  0x59   : > { %1543 = vmatpush3.bf16.msra.mxu1 %v1748_v23  ;;  %1432 = vmatprep.subr.bf16.mxu0 %v1749_v24  ;;  %v1811_v4 = vld [vmem:[#allocation2 + $0x124] ss:$16 sps:$4 sm:$0xff]   ;;  %v1813_v5 = vld [vmem:[#allocation2 + $0x12c] ss:$16 sps:$4 sm:$0xff]   ;;  %v1815_v6 = vld [vmem:[#allocation2 + $0x120] ss:$16 sps:$4 sm:$0xff]  }
  0x5a   : > { %1544 = vmatprep.subr.bf16.mxu1 %v1750_v25  ;;  %v1816_v7 = vld [vmem:[#allocation2 + $0x128] ss:$16 sps:$4 sm:$0xff]   ;;  %v1817_v8 = vld [vmem:[#allocation2 + $0x144] ss:$16 sps:$4 sm:$0xff]   ;;  %v1819_v9 = vld [vmem:[#allocation2 + $0x14c] ss:$16 sps:$4 sm:$0xff]  }
  0x5b   : > { %v1821_v10 = vld [vmem:[#allocation2 + $0x140] ss:$16 sps:$4 sm:$0xff]   ;;  %v1822_v11 = vld [vmem:[#allocation2 + $0x148] ss:$16 sps:$4 sm:$0xff]   ;;  %v1823_v12 = vld [vmem:[#allocation2 + $0x164] ss:$16 sps:$4 sm:$0xff]  }
  0x5c   : > { %1433 = vmatpush3.bf16.msra.mxu0 %v1751_v26  ;;  %v1825_v13 = vld [vmem:[#allocation2 + $0x16c] ss:$16 sps:$4 sm:$0xff]   ;;  %v1827_v14 = vld [vmem:[#allocation2 + $0x160] ss:$16 sps:$4 sm:$0xff]   ;;  %v1828_v15 = vld [vmem:[#allocation2 + $0x168] ss:$16 sps:$4 sm:$0xff]  }
  0x5d   : > { %1545 = vmatpush3.bf16.msra.mxu1 %v1752_v27  ;;  %1434 = vmatprep.subr.bf16.mxu0 %v1753_v28  ;;  %v1829_v16 = vld [vmem:[#allocation2 + $0x184] ss:$16 sps:$4 sm:$0xff]   ;;  %v1831_v17 = vld [vmem:[#allocation2 + $0x18c] ss:$16 sps:$4 sm:$0xff]   ;;  %v1833_v18 = vld [vmem:[#allocation2 + $0x180] ss:$16 sps:$4 sm:$0xff]  }
  0x5e   : > { %1546 = vmatprep.subr.bf16.mxu1 %v1754_v29  ;;  %v1834_v19 = vld [vmem:[#allocation2 + $0x188] ss:$16 sps:$4 sm:$0xff]   ;;  %v1835_v20 = vld [vmem:[#allocation2 + $0x1a4] ss:$16 sps:$4 sm:$0xff]   ;;  %v1837_v21 = vld [vmem:[#allocation2 + $0x1ac] ss:$16 sps:$4 sm:$0xff]  }
  0x5f   : > { %v1839_v22 = vld [vmem:[#allocation2 + $0x1a0] ss:$16 sps:$4 sm:$0xff]   ;;  %v1840_v23 = vld [vmem:[#allocation2 + $0x1a8] ss:$16 sps:$4 sm:$0xff]   ;;  %v1841_v24 = vld [vmem:[#allocation2 + $0x1c4] ss:$16 sps:$4 sm:$0xff]  }
  0x60   : > { %1435 = vmatpush3.bf16.msra.mxu0 %v1755_v30  ;;  %v1843_v25 = vld [vmem:[#allocation2 + $0x1cc] ss:$16 sps:$4 sm:$0xff]   ;;  %v1845_v26 = vld [vmem:[#allocation2 + $0x1c0] ss:$16 sps:$4 sm:$0xff]   ;;  %v1846_v27 = vld [vmem:[#allocation2 + $0x1c8] ss:$16 sps:$4 sm:$0xff]  }
  0x61   : > { %1547 = vmatpush3.bf16.msra.mxu1 %v1756_v31  ;;  %v1847_v28 = vld [vmem:[#allocation2 + $0x1e4] ss:$16 sps:$4 sm:$0xff]   ;;  %v1849_v29 = vld [vmem:[#allocation2 + $0x1ec] ss:$16 sps:$4 sm:$0xff]   ;;  %v1851_v30 = vld [vmem:[#allocation2 + $0x1e0] ss:$16 sps:$4 sm:$0xff]  }
  0x62   : > { %v1852_v31 = vld [vmem:[#allocation2 + $0x1e8] ss:$16 sps:$4 sm:$0xff]  }
  0x63   : > { %875 = vmatmul.mubr.bf16.vlgmr.msra.gmra.mxu0 %v1757_v32 }
  0x64   : > { %1036 = vmatmul.mubr.bf16.vlgmr.msra.gmra.mxu1 %v1760_v34  ;;  %882 = vmatprep.mubr.bf16.mxu0 %v1763_v36 }
  0x65   : > { %1043 = vmatprep.mubr.bf16.mxu1 %v1765_v37 }
  0x6b   : > { %883 = vmatmul.mubr.bf16.gmra.mxu0 %v1767_v38 }
  0x6c   : > { %1044 = vmatmul.mubr.bf16.gmra.mxu1 %v1768_v39  ;;  %890 = vmatprep.mubr.bf16.mxu0 %v1769_v40 }
  0x6d   : > { %1051 = vmatprep.mubr.bf16.mxu1 %v1771_v41 }
  0x73   : > { %891 = vmatmul.mubr.bf16.gmra.mxu0 %v1773_v42 }
  0x74   : > { %1052 = vmatmul.mubr.bf16.gmra.mxu1 %v1774_v43  ;;  %898 = vmatprep.mubr.bf16.mxu0 %v1775_v44 }
  0x75   : > { %1059 = vmatprep.mubr.bf16.mxu1 %v1777_v45 }
  0x7b   : > { %899 = vmatmul.mubr.bf16.gmra.mxu0 %v1779_v46 }
  0x7c   : > { %1060 = vmatmul.mubr.bf16.gmra.mxu1 %v1780_v47  ;;  %906 = vmatprep.mubr.bf16.mxu0 %v1781_v48 }
  0x7d   : > { %1067 = vmatprep.mubr.bf16.mxu1 %v1783_v49 }
  0x83   : > { %907 = vmatmul.mubr.bf16.gmra.mxu0 %v1785_v50 }
  0x84   : > { %1068 = vmatmul.mubr.bf16.gmra.mxu1 %v1786_v51  ;;  %914 = vmatprep.mubr.bf16.mxu0 %v1787_v52 }
  0x85   : > { %1075 = vmatprep.mubr.bf16.mxu1 %v1789_v53 }
  0x8b   : > { %915 = vmatmul.mubr.bf16.gmra.mxu0 %v1791_v54 }
  0x8c   : > { %1076 = vmatmul.mubr.bf16.gmra.mxu1 %v1792_v55  ;;  %922 = vmatprep.mubr.bf16.mxu0 %v1793_v56 }
  0x8d   : > { %1083 = vmatprep.mubr.bf16.mxu1 %v1795_v57 }
  0x93   : > { %923 = vmatmul.mubr.bf16.gmra.mxu0 %v1797_v58 }
  0x94   : > { %1084 = vmatmul.mubr.bf16.gmra.mxu1 %v1798_v59  ;;  %930 = vmatprep.mubr.bf16.mxu0 %v1799_v60 }
  0x95   : > { %1091 = vmatprep.mubr.bf16.mxu1 %v1801_v61 }
  0x9b   : > { %931 = vmatmul.mubr.bf16.gmra.mxu0 %v1803_v62 }
  0x9c   : > { %1092 = vmatmul.mubr.bf16.gmra.mxu1 %v1804_v63  ;;  %938 = vmatprep.mubr.bf16.mxu0 %v1805_v0 }
  0x9d   : > { %1099 = vmatprep.mubr.bf16.mxu1 %v1807_v1 }
  0xa3   : > { %939 = vmatmul.mubr.bf16.gmra.mxu0 %v1809_v2 }
  0xa4   : > { %1100 = vmatmul.mubr.bf16.gmra.mxu1 %v1810_v3  ;;  %946 = vmatprep.mubr.bf16.mxu0 %v1811_v4 }
  0xa5   : > { %1107 = vmatprep.mubr.bf16.mxu1 %v1813_v5 }
  0xab   : > { %947 = vmatmul.mubr.bf16.gmra.mxu0 %v1815_v6 }
  0xac   : > { %1108 = vmatmul.mubr.bf16.gmra.mxu1 %v1816_v7  ;;  %954 = vmatprep.mubr.bf16.mxu0 %v1817_v8 }
  0xad   : > { %1115 = vmatprep.mubr.bf16.mxu1 %v1819_v9 }
  0xb3   : > { %955 = vmatmul.mubr.bf16.gmra.mxu0 %v1821_v10 }
  0xb4   : > { %1116 = vmatmul.mubr.bf16.gmra.mxu1 %v1822_v11  ;;  %962 = vmatprep.mubr.bf16.mxu0 %v1823_v12 }
  0xb5   : > { %1123 = vmatprep.mubr.bf16.mxu1 %v1825_v13 }
  0xbb   : > { %963 = vmatmul.mubr.bf16.gmra.mxu0 %v1827_v14 }
  0xbc   : > { %1124 = vmatmul.mubr.bf16.gmra.mxu1 %v1828_v15  ;;  %970 = vmatprep.mubr.bf16.mxu0 %v1829_v16 }
  0xbd   : > { %1131 = vmatprep.mubr.bf16.mxu1 %v1831_v17 }
  0xc3   : > { %971 = vmatmul.mubr.bf16.gmra.mxu0 %v1833_v18 }
  0xc4   : > { %1132 = vmatmul.mubr.bf16.gmra.mxu1 %v1834_v19  ;;  %978 = vmatprep.mubr.bf16.mxu0 %v1835_v20 }
  0xc5   : > { %1139 = vmatprep.mubr.bf16.mxu1 %v1837_v21 }
  0xcb   : > { %979 = vmatmul.mubr.bf16.gmra.mxu0 %v1839_v22 }
  0xcc   : > { %1140 = vmatmul.mubr.bf16.gmra.mxu1 %v1840_v23  ;;  %986 = vmatprep.mubr.bf16.mxu0 %v1841_v24 }
  0xcd   : > { %1147 = vmatprep.mubr.bf16.mxu1 %v1843_v25 }
  0xd3   : > { %987 = vmatmul.mubr.bf16.gmra.mxu0 %v1845_v26 }
  0xd4   : > { %1148 = vmatmul.mubr.bf16.gmra.mxu1 %v1846_v27  ;;  %994 = vmatprep.mubr.bf16.mxu0 %v1847_v28 }
  0xd5   : > { %1155 = vmatprep.mubr.bf16.mxu1 %v1849_v29 }
  0xdb   : > { %995 = vmatmul.mubr.bf16.gmra.mxu0 %v1851_v30 }
  0xdc   : > { %1156 = vmatmul.mubr.bf16.gmra.mxu1 %v1852_v31 }
 0x123   : > { %v1436_v32 = vpop.f32.mrf.mxu0 }
 0x124   : > { %v1548_v33 = vpop.f32.mrf.mxu1 }
 0x125   : > { %v1437_v34 = vpop.f32.mrf.mxu0 }
 0x126   : > { %v1438_v35 = vadd.f32 %v1437_v34, %v1436_v32  ;;  %v1549_v36 = vpop.f32.mrf.mxu1 }
 0x127   : > { %v1550_v37 = vadd.f32 %v1549_v36, %v1548_v33  ;;  %v1439_v38 = vpop.f32.mrf.mxu0 }
 0x128   : > { %v1551_v39 = vpop.f32.mrf.mxu1 }
 0x129   : > { %v1038_v40 = vadd.f32 %v1550_v37, %v1438_v35  ;;  %v1440_v41 = vpop.f32.mrf.mxu0 }
 0x12a   : > { %v1441_v42 = vadd.f32 %v1440_v41, %v1439_v38  ;;  %v1552_v43 = vpop.f32.mrf.mxu1 }
 0x12b   : > { %1164 = vst [vmem:[%s2178_s17] sm:$0xff] %v1038_v40  ;;  %v1553_v44 = vadd.f32 %v1552_v43, %v1551_v39  ;;  %v1442_v45 = vpop.f32.mrf.mxu0 }
 0x12c   : > { %v1554_v46 = vpop.f32.mrf.mxu1 }
 0x12d   : > { %v1041_v47 = vadd.f32 %v1553_v44, %v1441_v42  ;;  %v1443_v48 = vpop.f32.mrf.mxu0 }
 0x12e   : > { %v1444_v49 = vadd.f32 %v1443_v48, %v1442_v45  ;;  %v1555_v50 = vpop.f32.mrf.mxu1 }
 0x12f   : > { %1165 = vst [vmem:[%s2178_s17 + $0x8] sm:$0xff] %v1041_v47  ;;  %v1556_v51 = vadd.f32 %v1555_v50, %v1554_v46  ;;  %v1445_v52 = vpop.f32.mrf.mxu0 }
 0x130   : > { %v1557_v53 = vpop.f32.mrf.mxu1 }
 0x131   : > { %v1046_v54 = vadd.f32 %v1556_v51, %v1444_v49  ;;  %v1446_v55 = vpop.f32.mrf.mxu0 }
 0x132   : > { %v1447_v56 = vadd.f32 %v1446_v55, %v1445_v52  ;;  %v1558_v57 = vpop.f32.mrf.mxu1 }
 0x133   : > { %1166 = vst [vmem:[%s2178_s17 + $0x10] sm:$0xff] %v1046_v54  ;;  %v1559_v58 = vadd.f32 %v1558_v57, %v1557_v53  ;;  %v1448_v59 = vpop.f32.mrf.mxu0 }
 0x134   : > { %v1560_v60 = vpop.f32.mrf.mxu1 }
 0x135   : > { %v1049_v61 = vadd.f32 %v1559_v58, %v1447_v56  ;;  %v1449_v62 = vpop.f32.mrf.mxu0 }
 0x136   : > { %v1450_v63 = vadd.f32 %v1449_v62, %v1448_v59  ;;  %v1561_v0 = vpop.f32.mrf.mxu1 }
 0x137   : > { %1167 = vst [vmem:[%s2178_s17 + $0x18] sm:$0xff] %v1049_v61  ;;  %v1562_v1 = vadd.f32 %v1561_v0, %v1560_v60  ;;  %v1451_v2 = vpop.f32.mrf.mxu0 }
 0x138   : > { %v1563_v3 = vpop.f32.mrf.mxu1 }
 0x139   : > { %v1054_v4 = vadd.f32 %v1562_v1, %v1450_v63  ;;  %v1452_v5 = vpop.f32.mrf.mxu0 }
 0x13a   : > { %v1453_v6 = vadd.f32 %v1452_v5, %v1451_v2  ;;  %v1564_v7 = vpop.f32.mrf.mxu1 }
 0x13b   : > { %1168 = vst [vmem:[%s2178_s17 + $0x20] sm:$0xff] %v1054_v4  ;;  %v1565_v8 = vadd.f32 %v1564_v7, %v1563_v3  ;;  %v1454_v9 = vpop.f32.mrf.mxu0 }
 0x13c   : > { %v1566_v10 = vpop.f32.mrf.mxu1 }
 0x13d   : > { %v1057_v11 = vadd.f32 %v1565_v8, %v1453_v6  ;;  %v1455_v12 = vpop.f32.mrf.mxu0 }
 0x13e   : > { %v1456_v13 = vadd.f32 %v1455_v12, %v1454_v9  ;;  %v1567_v14 = vpop.f32.mrf.mxu1 }
 0x13f   : > { %1169 = vst [vmem:[%s2178_s17 + $0x28] sm:$0xff] %v1057_v11  ;;  %v1568_v15 = vadd.f32 %v1567_v14, %v1566_v10  ;;  %v1457_v16 = vpop.f32.mrf.mxu0 }
 0x140   : > { %v1569_v17 = vpop.f32.mrf.mxu1 }
 0x141   : > { %v1062_v18 = vadd.f32 %v1568_v15, %v1456_v13  ;;  %v1458_v19 = vpop.f32.mrf.mxu0 }
 0x142   : > { %v1459_v20 = vadd.f32 %v1458_v19, %v1457_v16  ;;  %v1570_v21 = vpop.f32.mrf.mxu1 }
 0x143   : > { %1170 = vst [vmem:[%s2178_s17 + $0x30] sm:$0xff] %v1062_v18  ;;  %v1571_v22 = vadd.f32 %v1570_v21, %v1569_v17  ;;  %v1460_v23 = vpop.f32.mrf.mxu0 }
 0x144   : > { %v1572_v24 = vpop.f32.mrf.mxu1 }
 0x145   : > { %v1065_v25 = vadd.f32 %v1571_v22, %v1459_v20  ;;  %v1461_v26 = vpop.f32.mrf.mxu0 }
 0x146   : > { %v1462_v27 = vadd.f32 %v1461_v26, %v1460_v23  ;;  %v1573_v28 = vpop.f32.mrf.mxu1 }
 0x147   : > { %1171 = vst [vmem:[%s2178_s17 + $0x38] sm:$0xff] %v1065_v25  ;;  %v1574_v29 = vadd.f32 %v1573_v28, %v1572_v24  ;;  %v1463_v30 = vpop.f32.mrf.mxu0 }
 0x148   : > { %v1575_v31 = vpop.f32.mrf.mxu1 }
 0x149   : > { %v1070_v32 = vadd.f32 %v1574_v29, %v1462_v27  ;;  %v1464_v33 = vpop.f32.mrf.mxu0 }
 0x14a   : > { %v1465_v34 = vadd.f32 %v1464_v33, %v1463_v30  ;;  %v1576_v35 = vpop.f32.mrf.mxu1 }
 0x14b   : > { %1172 = vst [vmem:[%s2178_s17 + $0x40] sm:$0xff] %v1070_v32  ;;  %v1577_v36 = vadd.f32 %v1576_v35, %v1575_v31  ;;  %v1466_v37 = vpop.f32.mrf.mxu0 }
 0x14c   : > { %v1578_v38 = vpop.f32.mrf.mxu1 }
 0x14d   : > { %v1073_v39 = vadd.f32 %v1577_v36, %v1465_v34  ;;  %v1467_v40 = vpop.f32.mrf.mxu0 }
 0x14e   : > { %v1468_v41 = vadd.f32 %v1467_v40, %v1466_v37  ;;  %v1579_v42 = vpop.f32.mrf.mxu1 }
 0x14f   : > { %1173 = vst [vmem:[%s2178_s17 + $0x48] sm:$0xff] %v1073_v39  ;;  %v1580_v43 = vadd.f32 %v1579_v42, %v1578_v38  ;;  %v1469_v44 = vpop.f32.mrf.mxu0 }
 0x150   : > { %v1581_v45 = vpop.f32.mrf.mxu1 }
 0x151   : > { %v1078_v46 = vadd.f32 %v1580_v43, %v1468_v41  ;;  %v1470_v47 = vpop.f32.mrf.mxu0 }
 0x152   : > { %v1471_v48 = vadd.f32 %v1470_v47, %v1469_v44  ;;  %v1582_v49 = vpop.f32.mrf.mxu1 }
 0x153   : > { %1174 = vst [vmem:[%s2178_s17 + $0x50] sm:$0xff] %v1078_v46  ;;  %v1583_v50 = vadd.f32 %v1582_v49, %v1581_v45  ;;  %v1472_v51 = vpop.f32.mrf.mxu0 }
 0x154   : > { %v1584_v52 = vpop.f32.mrf.mxu1 }
 0x155   : > { %v1081_v53 = vadd.f32 %v1583_v50, %v1471_v48  ;;  %v1473_v54 = vpop.f32.mrf.mxu0 }
 0x156   : > { %v1474_v55 = vadd.f32 %v1473_v54, %v1472_v51  ;;  %v1585_v56 = vpop.f32.mrf.mxu1 }
 0x157   : > { %1175 = vst [vmem:[%s2178_s17 + $0x58] sm:$0xff] %v1081_v53  ;;  %v1586_v57 = vadd.f32 %v1585_v56, %v1584_v52  ;;  %v1475_v58 = vpop.f32.mrf.mxu0 }
 0x158   : > { %v1587_v59 = vpop.f32.mrf.mxu1 }
 0x159   : > { %v1086_v60 = vadd.f32 %v1586_v57, %v1474_v55  ;;  %v1476_v61 = vpop.f32.mrf.mxu0 }
 0x15a   : > { %v1477_v62 = vadd.f32 %v1476_v61, %v1475_v58  ;;  %v1588_v63 = vpop.f32.mrf.mxu1 }
 0x15b   : > { %1176 = vst [vmem:[%s2178_s17 + $0x60] sm:$0xff] %v1086_v60  ;;  %v1589_v0 = vadd.f32 %v1588_v63, %v1587_v59  ;;  %v1478_v1 = vpop.f32.mrf.mxu0 }
 0x15c   : > { %v1590_v2 = vpop.f32.mrf.mxu1 }
 0x15d   : > { %v1089_v3 = vadd.f32 %v1589_v0, %v1477_v62  ;;  %v1479_v4 = vpop.f32.mrf.mxu0 }
 0x15e   : > { %v1480_v5 = vadd.f32 %v1479_v4, %v1478_v1  ;;  %v1591_v6 = vpop.f32.mrf.mxu1 }
 0x15f   : > { %1177 = vst [vmem:[%s2178_s17 + $0x68] sm:$0xff] %v1089_v3  ;;  %v1592_v7 = vadd.f32 %v1591_v6, %v1590_v2  ;;  %v1481_v8 = vpop.f32.mrf.mxu0 }
 0x160   : > { %v1593_v9 = vpop.f32.mrf.mxu1 }
 0x161   : > { %v1094_v10 = vadd.f32 %v1592_v7, %v1480_v5  ;;  %v1482_v11 = vpop.f32.mrf.mxu0 }
 0x162   : > { %v1483_v12 = vadd.f32 %v1482_v11, %v1481_v8  ;;  %v1594_v13 = vpop.f32.mrf.mxu1 }
 0x163   : > { %1178 = vst [vmem:[%s2178_s17 + $0x70] sm:$0xff] %v1094_v10  ;;  %v1595_v14 = vadd.f32 %v1594_v13, %v1593_v9  ;;  %v1484_v15 = vpop.f32.mrf.mxu0 }
 0x164   : > { %v1596_v16 = vpop.f32.mrf.mxu1 }
 0x165   : > { %v1097_v17 = vadd.f32 %v1595_v14, %v1483_v12  ;;  %v1485_v18 = vpop.f32.mrf.mxu0 }
 0x166   : > { %v1486_v19 = vadd.f32 %v1485_v18, %v1484_v15  ;;  %v1597_v20 = vpop.f32.mrf.mxu1 }
 0x167   : > { %1179 = vst [vmem:[%s2178_s17 + $0x78] sm:$0xff] %v1097_v17  ;;  %v1598_v21 = vadd.f32 %v1597_v20, %v1596_v16  ;;  %v1487_v22 = vpop.f32.mrf.mxu0 }
 0x168   : > { %v1599_v23 = vpop.f32.mrf.mxu1 }
 0x169   : > { %v1102_v24 = vadd.f32 %v1598_v21, %v1486_v19  ;;  %v1488_v25 = vpop.f32.mrf.mxu0 }
 0x16a   : > { %v1489_v26 = vadd.f32 %v1488_v25, %v1487_v22  ;;  %v1600_v27 = vpop.f32.mrf.mxu1 }
 0x16b   : > { %1180 = vst [vmem:[%s2178_s17 + $0x80] sm:$0xff] %v1102_v24  ;;  %v1601_v28 = vadd.f32 %v1600_v27, %v1599_v23  ;;  %v1490_v29 = vpop.f32.mrf.mxu0 }
 0x16c   : > { %v1602_v30 = vpop.f32.mrf.mxu1 }
 0x16d   : > { %v1105_v31 = vadd.f32 %v1601_v28, %v1489_v26  ;;  %v1491_v32 = vpop.f32.mrf.mxu0 }
 0x16e   : > { %v1492_v33 = vadd.f32 %v1491_v32, %v1490_v29  ;;  %v1603_v34 = vpop.f32.mrf.mxu1 }
 0x16f   : > { %1181 = vst [vmem:[%s2178_s17 + $0x88] sm:$0xff] %v1105_v31  ;;  %v1604_v35 = vadd.f32 %v1603_v34, %v1602_v30  ;;  %v1493_v36 = vpop.f32.mrf.mxu0 }
 0x170   : > { %v1605_v37 = vpop.f32.mrf.mxu1 }
 0x171   : > { %v1110_v38 = vadd.f32 %v1604_v35, %v1492_v33  ;;  %v1494_v39 = vpop.f32.mrf.mxu0 }
 0x172   : > { %v1495_v40 = vadd.f32 %v1494_v39, %v1493_v36  ;;  %v1606_v41 = vpop.f32.mrf.mxu1 }
 0x173   : > { %1182 = vst [vmem:[%s2178_s17 + $0x90] sm:$0xff] %v1110_v38  ;;  %v1607_v42 = vadd.f32 %v1606_v41, %v1605_v37  ;;  %v1496_v43 = vpop.f32.mrf.mxu0 }
 0x174   : > { %v1608_v44 = vpop.f32.mrf.mxu1 }
 0x175   : > { %v1113_v45 = vadd.f32 %v1607_v42, %v1495_v40  ;;  %v1497_v46 = vpop.f32.mrf.mxu0 }
 0x176   : > { %v1498_v47 = vadd.f32 %v1497_v46, %v1496_v43  ;;  %v1609_v48 = vpop.f32.mrf.mxu1 }
 0x177   : > { %1183 = vst [vmem:[%s2178_s17 + $0x98] sm:$0xff] %v1113_v45  ;;  %v1610_v49 = vadd.f32 %v1609_v48, %v1608_v44  ;;  %v1499_v50 = vpop.f32.mrf.mxu0 }
 0x178   : > { %v1611_v51 = vpop.f32.mrf.mxu1 }
 0x179   : > { %v1118_v52 = vadd.f32 %v1610_v49, %v1498_v47  ;;  %v1500_v53 = vpop.f32.mrf.mxu0 }
 0x17a   : > { %v1501_v54 = vadd.f32 %v1500_v53, %v1499_v50  ;;  %v1612_v55 = vpop.f32.mrf.mxu1 }
 0x17b   : > { %1184 = vst [vmem:[%s2178_s17 + $0xa0] sm:$0xff] %v1118_v52  ;;  %v1613_v56 = vadd.f32 %v1612_v55, %v1611_v51  ;;  %v1502_v57 = vpop.f32.mrf.mxu0 }
 0x17c   : > { %v1614_v58 = vpop.f32.mrf.mxu1 }
 0x17d   : > { %v1121_v59 = vadd.f32 %v1613_v56, %v1501_v54  ;;  %v1503_v60 = vpop.f32.mrf.mxu0 }
 0x17e   : > { %v1504_v61 = vadd.f32 %v1503_v60, %v1502_v57  ;;  %v1615_v62 = vpop.f32.mrf.mxu1 }
 0x17f   : > { %1185 = vst [vmem:[%s2178_s17 + $0xa8] sm:$0xff] %v1121_v59  ;;  %v1616_v63 = vadd.f32 %v1615_v62, %v1614_v58  ;;  %v1505_v0 = vpop.f32.mrf.mxu0 }
 0x180   : > { %v1617_v1 = vpop.f32.mrf.mxu1 }
 0x181   : > { %v1126_v2 = vadd.f32 %v1616_v63, %v1504_v61  ;;  %v1506_v3 = vpop.f32.mrf.mxu0 }
 0x182   : > { %v1507_v4 = vadd.f32 %v1506_v3, %v1505_v0  ;;  %v1618_v5 = vpop.f32.mrf.mxu1 }
 0x183   : > { %1186 = vst [vmem:[%s2178_s17 + $0xb0] sm:$0xff] %v1126_v2  ;;  %v1619_v6 = vadd.f32 %v1618_v5, %v1617_v1  ;;  %v1508_v7 = vpop.f32.mrf.mxu0 }
 0x184   : > { %v1620_v8 = vpop.f32.mrf.mxu1 }
 0x185   : > { %v1129_v9 = vadd.f32 %v1619_v6, %v1507_v4  ;;  %v1509_v10 = vpop.f32.mrf.mxu0 }
 0x186   : > { %v1510_v11 = vadd.f32 %v1509_v10, %v1508_v7  ;;  %v1621_v12 = vpop.f32.mrf.mxu1 }
 0x187   : > { %1187 = vst [vmem:[%s2178_s17 + $0xb8] sm:$0xff] %v1129_v9  ;;  %v1622_v13 = vadd.f32 %v1621_v12, %v1620_v8  ;;  %v1511_v14 = vpop.f32.mrf.mxu0 }
 0x188   : > { %v1623_v15 = vpop.f32.mrf.mxu1 }
 0x189   : > { %v1134_v16 = vadd.f32 %v1622_v13, %v1510_v11  ;;  %v1512_v17 = vpop.f32.mrf.mxu0 }
 0x18a   : > { %v1513_v18 = vadd.f32 %v1512_v17, %v1511_v14  ;;  %v1624_v19 = vpop.f32.mrf.mxu1 }
 0x18b   : > { %1188 = vst [vmem:[%s2178_s17 + $0xc0] sm:$0xff] %v1134_v16  ;;  %v1625_v20 = vadd.f32 %v1624_v19, %v1623_v15  ;;  %v1514_v21 = vpop.f32.mrf.mxu0 }
 0x18c   : > { %v1626_v22 = vpop.f32.mrf.mxu1 }
 0x18d   : > { %v1137_v23 = vadd.f32 %v1625_v20, %v1513_v18  ;;  %v1515_v24 = vpop.f32.mrf.mxu0 }
 0x18e   : > { %v1516_v25 = vadd.f32 %v1515_v24, %v1514_v21  ;;  %v1627_v26 = vpop.f32.mrf.mxu1 }
 0x18f   : > { %1189 = vst [vmem:[%s2178_s17 + $0xc8] sm:$0xff] %v1137_v23  ;;  %v1628_v27 = vadd.f32 %v1627_v26, %v1626_v22  ;;  %v1517_v28 = vpop.f32.mrf.mxu0 }
 0x190   : > { %v1629_v29 = vpop.f32.mrf.mxu1 }
 0x191   : > { %v1142_v30 = vadd.f32 %v1628_v27, %v1516_v25  ;;  %v1518_v31 = vpop.f32.mrf.mxu0 }
 0x192   : > { %v1519_v32 = vadd.f32 %v1518_v31, %v1517_v28  ;;  %v1630_v33 = vpop.f32.mrf.mxu1 }
 0x193   : > { %1190 = vst [vmem:[%s2178_s17 + $0xd0] sm:$0xff] %v1142_v30  ;;  %v1631_v34 = vadd.f32 %v1630_v33, %v1629_v29  ;;  %v1520_v35 = vpop.f32.mrf.mxu0 }
 0x194   : > { %v1632_v36 = vpop.f32.mrf.mxu1 }
 0x195   : > { %v1145_v37 = vadd.f32 %v1631_v34, %v1519_v32  ;;  %v1521_v38 = vpop.f32.mrf.mxu0 }
 0x196   : > { %v1522_v39 = vadd.f32 %v1521_v38, %v1520_v35  ;;  %v1633_v40 = vpop.f32.mrf.mxu1 }
 0x197   : > { %1191 = vst [vmem:[%s2178_s17 + $0xd8] sm:$0xff] %v1145_v37  ;;  %v1634_v41 = vadd.f32 %v1633_v40, %v1632_v36  ;;  %v1523_v42 = vpop.f32.mrf.mxu0 }
 0x198   : > { %v1635_v43 = vpop.f32.mrf.mxu1 }
 0x199   : > { %v1150_v44 = vadd.f32 %v1634_v41, %v1522_v39  ;;  %v1524_v45 = vpop.f32.mrf.mxu0 }
 0x19a   : > { %v1525_v46 = vadd.f32 %v1524_v45, %v1523_v42  ;;  %v1636_v47 = vpop.f32.mrf.mxu1 }
 0x19b   : > { %1192 = vst [vmem:[%s2178_s17 + $0xe0] sm:$0xff] %v1150_v44  ;;  %v1637_v48 = vadd.f32 %v1636_v47, %v1635_v43  ;;  %v1526_v49 = vpop.f32.mrf.mxu0 }
 0x19c   : > { %v1638_v50 = vpop.f32.mrf.mxu1 }
 0x19d   : > { %v1153_v51 = vadd.f32 %v1637_v48, %v1525_v46  ;;  %v1527_v52 = vpop.f32.mrf.mxu0 }
 0x19e   : > { %v1528_v53 = vadd.f32 %v1527_v52, %v1526_v49  ;;  %v1639_v54 = vpop.f32.mrf.mxu1 }
 0x19f   : > { %1193 = vst [vmem:[%s2178_s17 + $0xe8] sm:$0xff] %v1153_v51  ;;  %v1640_v55 = vadd.f32 %v1639_v54, %v1638_v50  ;;  %v1529_v56 = vpop.f32.mrf.mxu0 }
 0x1a0   : > { %v1641_v57 = vpop.f32.mrf.mxu1 }
 0x1a1   : > { %v1158_v58 = vadd.f32 %v1640_v55, %v1528_v53  ;;  %v1530_v59 = vpop.f32.mrf.mxu0 }
 0x1a2   : > { %v1531_v60 = vadd.f32 %v1530_v59, %v1529_v56  ;;  %v1642_v61 = vpop.f32.mrf.mxu1 }
 0x1a3   : > { %1194 = vst [vmem:[%s2178_s17 + $0xf0] sm:$0xff] %v1158_v58  ;;  %v1643_v62 = vadd.f32 %v1642_v61, %v1641_v57 }
 0x1a5   : > { %v1161_v63 = vadd.f32 %v1643_v62, %v1531_v60 }
 0x1a7   : > { %1195 = vst [vmem:[%s2178_s17 + $0xf8] sm:$0xff] %v1161_v63 }
 0x1a8   : > { %1920 = shalt.err (!%p1917_p0)
}
 0x1a9   : > { %s1921_s3 = scalar_lea.hbm %s2216_s25, 4096  ;;  %s1925_s5 = scalar_lea.hbm %s2269_s2, 8192 }
 0x1aa   : > { %p1922_p1 = scmp.ne.s32.totalorder %s2216_s25, %s1921_s3  ;;  %p1926_p9 = scmp.lt.s32.totalorder %s2216_s25, %s2269_s2 }
 0x1ab   : > { %p1927_p11 = scmp.lt.s32.totalorder %s1925_s5, %s1921_s3 }
 0x1ac   : > { %p1923_p5 = pnand %p1922_p1, %p2284_p12 }
 0x1ad   : > { %p1928_p2 = por %p1927_p11, %p1926_p9 }
 0x1ae   : > { %p1924_p7 = pneg %p1923_p5 }
 0x1b0   : > { %p1929_p3 = pnand %p1928_p2, %p1924_p7 }
 0x1b2   : > { %1932 = shalt.err (!%p1929_p3)
}
 0x1b3   : > { %s2001_s16 = smov 128   ;;  %s2002_s26 = smov 256  }
 0x1b4   : > { %s2003_s17 = smov 8  }
 0x1b5   : > { %1650 = dma.vmem_to_hbm [thread:$0]  (%p2284_p12), %s2218_s22, 4096, %s2216_s25, %s1197_s12, %s2001_s16, %s2002_s26, %s2003_s17  }
 0x1b6 PF: > { %s2285_s19 = sld [smem:[#allocation11_spill]]  ;;  %s1227_s18 = sand.u32 1, %s1971_s9  }
 0x1b7   : > { %p2286_p13 = scmp.ne.s32.totalorder %s2279_s21, 0  ;;  %s1228_s23 = scalar_lea.sflag [#allocation4], %s1227_s18 }
 0x1bc   : > { %p2287_p4 = scmp.ge.s32.totalorder %s2285_s19, 2 }
 0x1be   : > { %p1661_p6 = pnand %p2287_p4, %p2286_p13 }
 0x1c0   : > { %p1662_p8 = pneg %p1661_p6 }
 0x1c2   : > { %1966 = dma.done.wait (%p1662_p8), %s1228_s23, 4096  }
 0x1c3   : > { %1968 = vsyncadd (%p1662_p8), %s1228_s23, 4294963200  ;;  %s19_s28 = sadd.s32 1, %s2285_s19   ;;  %s2288_s9 = smov %s1975_s10 }
 0x1c4   : > { %p16_p10 = scmp.ge.s32.totalorder %s19_s28, 4   ;;  %s2289_s10 = smov %s1979_s11 }
 0x1c5   : > { %s2290_s11 = smov %s2119_s14  ;;  %s2291_s12 = smov %s1987_s13 }
 0x1c6   : > { %s2292_s13 = smov %s2295_s27  ;;  %s2293_s14 = smov %s19_s28 }
 0x1c7   :  { %18 = sbr.rel (!%p16_p10) target bundleno = 7 (0x7), region = 79 }
 0x1cc   :  { %1233 = vsyncpa [#allocation3], 1 }
 0x1cd   :  { %1235 = vsyncpa [#allocation3 + $0x1], 1 }
 0x1ce   :  { %1236 = vsyncpa [#allocation6], 1 }
 0x1cf   :  { %1238 = vsyncpa [#allocation6 + $0x1], 1 }
 0x1d0   :  { %1239 = vsyncpa [#allocation4], 1 }
 0x1d1   :  { %1241 = vsyncpa [#allocation4 + $0x1], 1 }

</bundles_post_ra>
